<compile_context>
chip_gen: v5e
topology: v5e:2x2
jax: 0.10.0
libtpu: 0.0.40
codegen_flags: <defaults>
</compile_context>

<pallas_src>
import functools

import jax
import jax.numpy as jnp
import numpy as np
from jax.experimental import pallas as pl
from jax.experimental.pallas import tpu as pltpu

INPUT_DIM = 1       # n (number of angles)
U_DIM = 1
HIDDEN = 32
FUSED = 2 * HIDDEN  # M_net and g_net packed side by side
BATCH = 8

# Fused M+g parameter slab (width FUSED=64), row layout:
#   0: [wm1[0,:] | wg1[0,:]]   (cos-row of fused layer 1)
#   1: [wm1[1,:] | wg1[1,:]]   (sin-row of fused layer 1)
#   2: [bm1 | bg1]     3: [bm2 | bg2]
#   4: [wm3^T | 0]     5: [0 | wg3^T]
#   6: [bm3, bg3, 0, ...]      7: zero padding (8-row aligned header)
#   8:72    block-diagonal layer 2  [[wm2, 0], [0, wg2]]
#   72:136  its transpose
#
# H_net parameter slab (width HIDDEN=32), row layout:
#   0: wh1[0,:]  1: wh1[1,:]  2: wh1[2,:]  3: bh1  4: bh2  5: wh3^T
#   6,7: zero padding          8:40  wh2          40:72  wh2^T


# ----------------------------------------------------------------------------
# Pallas kernel: whole forward pass for the (bs, 4) state vector.
# ----------------------------------------------------------------------------
def symoden_kernel(x_ref, mg_ref, h_ref, out_ref):
    # default matmul precision: single bf16 MXU pass with f32 accumulation
    dot = functools.partial(jnp.dot, preferred_element_type=jnp.float32)

    x = x_ref[...]                       # (bs, 4) = (cos q, sin q, q_dot, u)
    cos_q = x[:, 0:1]
    sin_q = x[:, 1:2]
    q_dot = x[:, 2:3]
    u = x[:, 3:4]

    # ---- fused M_net + g_net forward:  2 -> 64 -> 64 -> (1, 1) --------------
    row_cos = mg_ref[0:1, :]             # (1, 64)
    row_sin = mg_ref[1:2, :]
    b1_mg = mg_ref[2:3, :]
    b2_mg = mg_ref[3:4, :]
    w3m_row = mg_ref[4:5, :]             # [wm3^T | 0]
    w3g_row = mg_ref[5:6, :]             # [0 | wg3^T]
    b3_row = mg_ref[6:7, :]              # [bm3, bg3, 0, ...]
    w2_mg = mg_ref[8:8 + FUSED, :]                   # (64, 64) block-diagonal
    w2t_mg = mg_ref[8 + FUSED:8 + 2 * FUSED, :]      # (64, 64) its transpose

    # layer 1: K=2 contraction as a VPU broadcast FMA (exact f32, no MXU)
    a1 = jnp.tanh(cos_q * row_cos + sin_q * row_sin + b1_mg)     # (bs, 64)
    # layer 2: one MXU matmul serving both sub-nets
    a2 = jnp.tanh(dot(a1, w2_mg) + b2_mg)                        # (bs, 64)
    # layer 3: N=1 outputs as exact lane reductions (XLU)
    M_q_inv = jnp.sum(a2 * w3m_row, axis=-1, keepdims=True) + b3_row[:, 0:1]
    g_q = jnp.sum(a2 * w3g_row, axis=-1, keepdims=True) + b3_row[:, 1:2]

    # p = q_dot / M_q_inv   (input_dim == 1 branch; exact divide, no approx)
    p = q_dot / M_q_inv                                          # (bs, 1)

    # analytic d(M_q_inv)/d(cos q, sin q) (replaces torch.autograd.grad).
    # The g_net half of gm1 is exactly zero (w3m_row is zero there), so the
    # fused block-diagonal transpose and the fused layer-1 rows can be reused.
    gm2 = (1.0 - a2 * a2) * w3m_row                              # (bs, 64)
    gm1 = dot(gm2, w2t_mg) * (1.0 - a1 * a1)                     # (bs, 64)
    dMinv_dcos = jnp.sum(gm1 * row_cos, axis=-1, keepdims=True)  # (bs, 1)
    dMinv_dsin = jnp.sum(gm1 * row_sin, axis=-1, keepdims=True)

    # ---- H_net(cos q, sin q, p): 3 -> 32 -> 32 -> 1 --------------------------
    h_cos = h_ref[0:1, :]                # (1, 32)
    h_sin = h_ref[1:2, :]
    h_p = h_ref[2:3, :]
    bh1 = h_ref[3:4, :]
    bh2 = h_ref[4:5, :]
    wh3_row = h_ref[5:6, :]
    wh2 = h_ref[8:8 + HIDDEN, :]                     # (32, 32)
    wh2t = h_ref[8 + HIDDEN:8 + 2 * HIDDEN, :]       # (32, 32)

    ah1 = jnp.tanh(cos_q * h_cos + sin_q * h_sin + p * h_p + bh1)  # VPU FMA
    ah2 = jnp.tanh(dot(ah1, wh2) + bh2)                            # MXU

    # analytic dH/d(cos q, sin q, p) (replaces torch.autograd.grad)
    gh2 = (1.0 - ah2 * ah2) * wh3_row
    gh1 = dot(gh2, wh2t) * (1.0 - ah1 * ah1)                       # MXU
    dHdcos_q = jnp.sum(gh1 * h_cos, axis=-1, keepdims=True)
    dHdsin_q = jnp.sum(gh1 * h_sin, axis=-1, keepdims=True)
    dHdp = jnp.sum(gh1 * h_p, axis=-1, keepdims=True)

    # ---- assemble the state derivative ---------------------------------------
    F = g_q * u                                   # u_dim == 1
    dq = dHdp
    dp = sin_q * dHdcos_q - cos_q * dHdsin_q + F
    dcos = -sin_q * dq
    dsin = cos_q * dq
    dM_inv_dt = dMinv_dcos * dcos + dMinv_dsin * dsin
    ddq = M_q_inv * dp + dM_inv_dt * p

    # direct column stores (no concatenate of width-1 columns)
    out_ref[:, 0:1] = dcos
    out_ref[:, 1:2] = dsin
    out_ref[:, 2:3] = ddq
    out_ref[:, 3:4] = jnp.zeros_like(ddq)


# ----------------------------------------------------------------------------
# Host-side parameter packing (built once) + wrapper
# ----------------------------------------------------------------------------
def pack_params(params):
    (wm1, bm1, wm2, bm2, wm3, bm3,
     wh1, bh1, wh2, bh2, wh3, bh3,
     wg1, bg1, wg2, bg2, wg3, bg3) = params
    del bh3  # H value itself is never needed, only dH

    zHH = jnp.zeros((HIDDEN, HIDDEN), jnp.float32)
    z1H = jnp.zeros((1, HIDDEN), jnp.float32)

    w2_mg = jnp.block([[wm2, zHH], [zHH, wg2]])          # (64, 64)
    mg_rows = jnp.concatenate([
        jnp.concatenate([wm1[0:1, :], wg1[0:1, :]], axis=1),
        jnp.concatenate([wm1[1:2, :], wg1[1:2, :]], axis=1),
        jnp.concatenate([bm1, bg1], axis=1),
        jnp.concatenate([bm2, bg2], axis=1),
        jnp.concatenate([wm3.T, z1H], axis=1),
        jnp.concatenate([z1H, wg3.T], axis=1),
        jnp.concatenate([bm3, bg3,
                         jnp.zeros((1, FUSED - 2), jnp.float32)], axis=1),
        jnp.zeros((1, FUSED), jnp.float32),
    ], axis=0)                                           # (8, 64)
    mg_slab = jnp.concatenate([mg_rows, w2_mg, w2_mg.T], axis=0)   # (136, 64)

    h_rows = jnp.concatenate([
        wh1[0:1, :], wh1[1:2, :], wh1[2:3, :], bh1, bh2, wh3.T,
        jnp.zeros((2, HIDDEN), jnp.float32),
    ], axis=0)                                           # (8, 32)
    h_slab = jnp.concatenate([h_rows, wh2, wh2.T], axis=0)         # (72, 32)
    return mg_slab, h_slab


@jax.jit
def symoden_forward(x, mg_slab, h_slab):
    vmem = pltpu.MemorySpace.VMEM
    # TODO(synk): when driven by an ODE integrator, add a grid over RK stages /
    # time steps with constant index_maps for the weight slabs (weights stay
    # VMEM-resident) and input_output_aliases for the state, and for large
    # batches add a "parallel" batch grid axis so v7x's second TensorCore is
    # used.  At BATCH=8 a single gridless invocation is optimal.
    return pl.pallas_call(
        symoden_kernel,
        out_shape=jax.ShapeDtypeStruct((x.shape[0], 4), jnp.float32),
        in_specs=[pl.BlockSpec(memory_space=vmem)] * 3,
        out_specs=pl.BlockSpec(memory_space=vmem),
    )(x, mg_slab, h_slab)


# ----------------------------------------------------------------------------
# Pure-JAX reference (uses jax.grad, mirrors the PyTorch forward exactly;
# dots forced to HIGHEST precision so it is a trustworthy f32 baseline)
# ----------------------------------------------------------------------------
def _mlp(z, W1, b1, W2, b2, W3, b3):
    hp = jax.lax.Precision.HIGHEST
    h1 = jnp.tanh(jnp.dot(z, W1, precision=hp) + b1)
    h2 = jnp.tanh(jnp.dot(h1, W2, precision=hp) + b2)
    return jnp.dot(h2, W3, precision=hp) + b3


def reference_forward(x, params):
    (wm1, bm1, wm2, bm2, wm3, bm3,
     wh1, bh1, wh2, bh2, wh3, bh3,
     wg1, bg1, wg2, bg2, wg3, bg3) = params
    M_net = lambda z: _mlp(z, wm1, bm1, wm2, bm2, wm3, bm3)
    H_net = lambda z: _mlp(z, wh1, bh1, wh2, bh2, wh3, bh3)
    g_net = lambda z: _mlp(z, wg1, bg1, wg2, bg2, wg3, bg3)

    bs = x.shape[0]
    zero_vec = jnp.zeros((bs, U_DIM), jnp.float32)
    cqsq, q_dot, u = x[:, :2], x[:, 2:3], x[:, 3:4]
    M_q_inv = M_net(cqsq)
    p = q_dot / M_q_inv
    cqsqp = jnp.concatenate([cqsq, p], axis=1)
    cqsq2, p2 = cqsqp[:, :2], cqsqp[:, 2:3]
    M_q_inv2 = M_net(cqsq2)
    cos_q, sin_q = cqsq2[:, 0:1], cqsq2[:, 1:2]

    dH = jax.grad(lambda z: H_net(z).sum())(cqsqp)
    dHdcos, dHdsin, dHdp = dH[:, 0:1], dH[:, 1:2], dH[:, 2:3]
    F = g_net(cqsq2) * u
    dq = dHdp
    dp = sin_q * dHdcos - cos_q * dHdsin + F

    dM_inv = jax.grad(lambda z: M_net(z).sum())(cqsq2)
    dM_inv_dt = jnp.sum(
        dM_inv * jnp.concatenate([-sin_q * dq, cos_q * dq], axis=1),
        axis=-1, keepdims=True)
    ddq = M_q_inv2 * dp + dM_inv_dt * p2
    return jnp.concatenate([-sin_q * dq, cos_q * dq, ddq, zero_vec], axis=1)


# ----------------------------------------------------------------------------
# Deterministic parameter init (PyTorch Linear-style uniform(-1/sqrt(fan_in)))
# ----------------------------------------------------------------------------
def _init_linear(key, fan_in, fan_out):
    kw, kb = jax.random.split(key)
    bound = 1.0 / np.sqrt(fan_in)
    W = jax.random.uniform(kw, (fan_in, fan_out), jnp.float32, -bound, bound)
    b = jax.random.uniform(kb, (1, fan_out), jnp.float32, -bound, bound)
    return W, b


def make_params(key):
    ks = jax.random.split(key, 9)
    # M_net: 2 -> H -> H -> 1
    wm1, bm1 = _init_linear(ks[0], 2 * INPUT_DIM, HIDDEN)
    wm2, bm2 = _init_linear(ks[1], HIDDEN, HIDDEN)
    wm3, _ = _init_linear(ks[2], HIDDEN, 1)
    bm3 = jnp.ones((1, 1), jnp.float32)          # keep M^-1 away from zero
    # H_net: 3 -> H -> H -> 1
    wh1, bh1 = _init_linear(ks[3], 3 * INPUT_DIM, HIDDEN)
    wh2, bh2 = _init_linear(ks[4], HIDDEN, HIDDEN)
    wh3, bh3 = _init_linear(ks[5], HIDDEN, 1)
    # g_net: 2 -> H -> H -> 1
    wg1, bg1 = _init_linear(ks[6], 2 * INPUT_DIM, HIDDEN)
    wg2, bg2 = _init_linear(ks[7], HIDDEN, HIDDEN)
    wg3, bg3 = _init_linear(ks[8], HIDDEN, 1)
    return (wm1, bm1, wm2, bm2, wm3, bm3,
            wh1, bh1, wh2, bh2, wh3, bh3,
            wg1, bg1, wg2, bg2, wg3, bg3)


# TODO(synk): the nfe counter and torch.enable_grad() context are host-side
# stateful conveniences with no kernel equivalent; autograd.grad is replaced by
# the analytic MLP input-gradients computed inside the kernel.

if __name__ == "__main__":
    key = jax.random.PRNGKey(0)
    kparam, kq, kqd, ku = jax.random.split(key, 4)

    params = make_params(kparam)
    mg_slab, h_slab = pack_params(params)     # packed once, 2 slabs -> 2 DMAs

    q = jax.random.uniform(kq, (BATCH, INPUT_DIM), jnp.float32, -np.pi, np.pi)
    q_dot = jax.random.normal(kqd, (BATCH, INPUT_DIM), jnp.float32)
    u = jax.random.normal(ku, (BATCH, U_DIM), jnp.float32)
    x = jnp.concatenate([jnp.cos(q), jnp.sin(q), q_dot, u], axis=1)  # (bs, 4)

    out = jax.block_until_ready(symoden_forward(x, mg_slab, h_slab))
    ref = jax.block_until_ready(reference_forward(x, params))

    # 5e-3 tolerance covers the kernel's default-precision (single-pass bf16)
    # MXU matmuls vs. the HIGHEST-precision reference; genuine bugs (wrong
    # transpose / sign / slice) produce O(0.1+) errors.
    np.testing.assert_allclose(np.asarray(out), np.asarray(ref),
                               rtol=5e-3, atol=5e-3)
    print("KERNEL_OK")
</pallas_src>

<mosaic_0001>
module attributes {stable_mosaic.version = 11 : i64} {
  func.func @symoden_kernel(%arg0: memref<8x4xf32, #tpu.memory_space<vmem>>, %arg1: memref<136x64xf32, #tpu.memory_space<vmem>>, %arg2: memref<72x32xf32, #tpu.memory_space<vmem>>, %arg3: memref<8x4xf32, #tpu.memory_space<vmem>>) attributes {dimension_semantics = [], scalar_prefetch = 0 : i64, scratch_operands = 0 : i64, tpu.core_type = #tpu.core_type<tc>} {
    %c0 = arith.constant 0 : index
    %c0_0 = arith.constant 0 : index
    %0 = vector.load %arg0[%c0, %c0_0] : memref<8x4xf32, #tpu.memory_space<vmem>>, vector<8x4xf32>
    %1 = vector.extract_strided_slice %0 {offsets = [0, 0], sizes = [8, 1], strides = [1, 1]} : vector<8x4xf32> to vector<8x1xf32>
    %2 = vector.extract_strided_slice %0 {offsets = [0, 1], sizes = [8, 1], strides = [1, 1]} : vector<8x4xf32> to vector<8x1xf32>
    %3 = vector.extract_strided_slice %0 {offsets = [0, 2], sizes = [8, 1], strides = [1, 1]} : vector<8x4xf32> to vector<8x1xf32>
    %4 = vector.extract_strided_slice %0 {offsets = [0, 3], sizes = [8, 1], strides = [1, 1]} : vector<8x4xf32> to vector<8x1xf32>
    %c0_1 = arith.constant 0 : index
    %c0_2 = arith.constant 0 : index
    %5 = vector.load %arg1[%c0_1, %c0_2] : memref<136x64xf32, #tpu.memory_space<vmem>>, vector<1x64xf32>
    %c1 = arith.constant 1 : index
    %c0_3 = arith.constant 0 : index
    %6 = vector.load %arg1[%c1, %c0_3] : memref<136x64xf32, #tpu.memory_space<vmem>>, vector<1x64xf32>
    %c2 = arith.constant 2 : index
    %c0_4 = arith.constant 0 : index
    %7 = vector.load %arg1[%c2, %c0_4] : memref<136x64xf32, #tpu.memory_space<vmem>>, vector<1x64xf32>
    %c3 = arith.constant 3 : index
    %c0_5 = arith.constant 0 : index
    %8 = vector.load %arg1[%c3, %c0_5] : memref<136x64xf32, #tpu.memory_space<vmem>>, vector<1x64xf32>
    %c4 = arith.constant 4 : index
    %c0_6 = arith.constant 0 : index
    %9 = vector.load %arg1[%c4, %c0_6] : memref<136x64xf32, #tpu.memory_space<vmem>>, vector<1x64xf32>
    %c5 = arith.constant 5 : index
    %c0_7 = arith.constant 0 : index
    %10 = vector.load %arg1[%c5, %c0_7] : memref<136x64xf32, #tpu.memory_space<vmem>>, vector<1x64xf32>
    %c6 = arith.constant 6 : index
    %c0_8 = arith.constant 0 : index
    %11 = vector.load %arg1[%c6, %c0_8] : memref<136x64xf32, #tpu.memory_space<vmem>>, vector<1x64xf32>
    %c8 = arith.constant 8 : index
    %c0_9 = arith.constant 0 : index
    %12 = vector.load %arg1[%c8, %c0_9] : memref<136x64xf32, #tpu.memory_space<vmem>>, vector<64x64xf32>
    %c72 = arith.constant 72 : index
    %c0_10 = arith.constant 0 : index
    %13 = vector.load %arg1[%c72, %c0_10] : memref<136x64xf32, #tpu.memory_space<vmem>>, vector<64x64xf32>
    %14 = vector.broadcast %1 : vector<8x1xf32> to vector<8x64xf32>
    %15 = vector.broadcast %5 : vector<1x64xf32> to vector<8x64xf32>
    %16 = arith.mulf %14, %15 : vector<8x64xf32>
    %17 = vector.broadcast %2 : vector<8x1xf32> to vector<8x64xf32>
    %18 = vector.broadcast %6 : vector<1x64xf32> to vector<8x64xf32>
    %19 = arith.mulf %17, %18 : vector<8x64xf32>
    %20 = arith.addf %16, %19 : vector<8x64xf32>
    %21 = vector.broadcast %7 : vector<1x64xf32> to vector<8x64xf32>
    %22 = arith.addf %20, %21 : vector<8x64xf32>
    %23 = math.tanh %22 : vector<8x64xf32>
    %cst = arith.constant dense<0.000000e+00> : vector<8x64xf32>
    %24 = tpu.matmul %23, %12, %cst {dimension_numbers = #tpu.dot_dimension_numbers<[1], [0], [0], [1], [0, 0, 1, 1], [], []>} : vector<8x64xf32>, vector<64x64xf32>, vector<8x64xf32> -> vector<8x64xf32>
    %25 = vector.broadcast %8 : vector<1x64xf32> to vector<8x64xf32>
    %26 = arith.addf %24, %25 : vector<8x64xf32>
    %27 = math.tanh %26 : vector<8x64xf32>
    %28 = vector.broadcast %9 : vector<1x64xf32> to vector<8x64xf32>
    %29 = arith.mulf %27, %28 : vector<8x64xf32>
    %cst_11 = arith.constant dense<0.000000e+00> : vector<8xf32>
    %30 = vector.multi_reduction <add>, %29, %cst_11 [1] : vector<8x64xf32> to vector<8xf32>
    %31 = vector.shape_cast %30 : vector<8xf32> to vector<8x1xf32>
    %32 = vector.extract_strided_slice %11 {offsets = [0, 0], sizes = [1, 1], strides = [1, 1]} : vector<1x64xf32> to vector<1x1xf32>
    %33 = vector.broadcast %32 : vector<1x1xf32> to vector<8x1xf32>
    %34 = arith.addf %31, %33 : vector<8x1xf32>
    %35 = vector.broadcast %10 : vector<1x64xf32> to vector<8x64xf32>
    %36 = arith.mulf %27, %35 : vector<8x64xf32>
    %cst_12 = arith.constant dense<0.000000e+00> : vector<8xf32>
    %37 = vector.multi_reduction <add>, %36, %cst_12 [1] : vector<8x64xf32> to vector<8xf32>
    %38 = vector.shape_cast %37 : vector<8xf32> to vector<8x1xf32>
    %39 = vector.extract_strided_slice %11 {offsets = [0, 1], sizes = [1, 1], strides = [1, 1]} : vector<1x64xf32> to vector<1x1xf32>
    %40 = vector.broadcast %39 : vector<1x1xf32> to vector<8x1xf32>
    %41 = arith.addf %38, %40 : vector<8x1xf32>
    %42 = arith.divf %3, %34 : vector<8x1xf32>
    %43 = arith.mulf %27, %27 : vector<8x64xf32>
    %cst_13 = arith.constant 1.000000e+00 : f32
    %44 = vector.broadcast %cst_13 : f32 to vector<8x64xf32>
    %45 = arith.subf %44, %43 : vector<8x64xf32>
    %46 = vector.broadcast %9 : vector<1x64xf32> to vector<8x64xf32>
    %47 = arith.mulf %45, %46 : vector<8x64xf32>
    %cst_14 = arith.constant dense<0.000000e+00> : vector<8x64xf32>
    %48 = tpu.matmul %47, %13, %cst_14 {dimension_numbers = #tpu.dot_dimension_numbers<[1], [0], [0], [1], [0, 0, 1, 1], [], []>} : vector<8x64xf32>, vector<64x64xf32>, vector<8x64xf32> -> vector<8x64xf32>
    %49 = arith.mulf %23, %23 : vector<8x64xf32>
    %cst_15 = arith.constant 1.000000e+00 : f32
    %50 = vector.broadcast %cst_15 : f32 to vector<8x64xf32>
    %51 = arith.subf %50, %49 : vector<8x64xf32>
    %52 = arith.mulf %48, %51 : vector<8x64xf32>
    %53 = vector.broadcast %5 : vector<1x64xf32> to vector<8x64xf32>
    %54 = arith.mulf %52, %53 : vector<8x64xf32>
    %cst_16 = arith.constant dense<0.000000e+00> : vector<8xf32>
    %55 = vector.multi_reduction <add>, %54, %cst_16 [1] : vector<8x64xf32> to vector<8xf32>
    %56 = vector.shape_cast %55 : vector<8xf32> to vector<8x1xf32>
    %57 = vector.broadcast %6 : vector<1x64xf32> to vector<8x64xf32>
    %58 = arith.mulf %52, %57 : vector<8x64xf32>
    %cst_17 = arith.constant dense<0.000000e+00> : vector<8xf32>
    %59 = vector.multi_reduction <add>, %58, %cst_17 [1] : vector<8x64xf32> to vector<8xf32>
    %60 = vector.shape_cast %59 : vector<8xf32> to vector<8x1xf32>
    %c0_18 = arith.constant 0 : index
    %c0_19 = arith.constant 0 : index
    %61 = vector.load %arg2[%c0_18, %c0_19] : memref<72x32xf32, #tpu.memory_space<vmem>>, vector<1x32xf32>
    %c1_20 = arith.constant 1 : index
    %c0_21 = arith.constant 0 : index
    %62 = vector.load %arg2[%c1_20, %c0_21] : memref<72x32xf32, #tpu.memory_space<vmem>>, vector<1x32xf32>
    %c2_22 = arith.constant 2 : index
    %c0_23 = arith.constant 0 : index
    %63 = vector.load %arg2[%c2_22, %c0_23] : memref<72x32xf32, #tpu.memory_space<vmem>>, vector<1x32xf32>
    %c3_24 = arith.constant 3 : index
    %c0_25 = arith.constant 0 : index
    %64 = vector.load %arg2[%c3_24, %c0_25] : memref<72x32xf32, #tpu.memory_space<vmem>>, vector<1x32xf32>
    %c4_26 = arith.constant 4 : index
    %c0_27 = arith.constant 0 : index
    %65 = vector.load %arg2[%c4_26, %c0_27] : memref<72x32xf32, #tpu.memory_space<vmem>>, vector<1x32xf32>
    %c5_28 = arith.constant 5 : index
    %c0_29 = arith.constant 0 : index
    %66 = vector.load %arg2[%c5_28, %c0_29] : memref<72x32xf32, #tpu.memory_space<vmem>>, vector<1x32xf32>
    %c8_30 = arith.constant 8 : index
    %c0_31 = arith.constant 0 : index
    %67 = vector.load %arg2[%c8_30, %c0_31] : memref<72x32xf32, #tpu.memory_space<vmem>>, vector<32x32xf32>
    %c40 = arith.constant 40 : index
    %c0_32 = arith.constant 0 : index
    %68 = vector.load %arg2[%c40, %c0_32] : memref<72x32xf32, #tpu.memory_space<vmem>>, vector<32x32xf32>
    %69 = vector.broadcast %1 : vector<8x1xf32> to vector<8x32xf32>
    %70 = vector.broadcast %61 : vector<1x32xf32> to vector<8x32xf32>
    %71 = arith.mulf %69, %70 : vector<8x32xf32>
    %72 = vector.broadcast %2 : vector<8x1xf32> to vector<8x32xf32>
    %73 = vector.broadcast %62 : vector<1x32xf32> to vector<8x32xf32>
    %74 = arith.mulf %72, %73 : vector<8x32xf32>
    %75 = arith.addf %71, %74 : vector<8x32xf32>
    %76 = vector.broadcast %42 : vector<8x1xf32> to vector<8x32xf32>
    %77 = vector.broadcast %63 : vector<1x32xf32> to vector<8x32xf32>
    %78 = arith.mulf %76, %77 : vector<8x32xf32>
    %79 = arith.addf %75, %78 : vector<8x32xf32>
    %80 = vector.broadcast %64 : vector<1x32xf32> to vector<8x32xf32>
    %81 = arith.addf %79, %80 : vector<8x32xf32>
    %82 = math.tanh %81 : vector<8x32xf32>
    %cst_33 = arith.constant dense<0.000000e+00> : vector<8x32xf32>
    %83 = tpu.matmul %82, %67, %cst_33 {dimension_numbers = #tpu.dot_dimension_numbers<[1], [0], [0], [1], [0, 0, 1, 1], [], []>} : vector<8x32xf32>, vector<32x32xf32>, vector<8x32xf32> -> vector<8x32xf32>
    %84 = vector.broadcast %65 : vector<1x32xf32> to vector<8x32xf32>
    %85 = arith.addf %83, %84 : vector<8x32xf32>
    %86 = math.tanh %85 : vector<8x32xf32>
    %87 = arith.mulf %86, %86 : vector<8x32xf32>
    %cst_34 = arith.constant 1.000000e+00 : f32
    %88 = vector.broadcast %cst_34 : f32 to vector<8x32xf32>
    %89 = arith.subf %88, %87 : vector<8x32xf32>
    %90 = vector.broadcast %66 : vector<1x32xf32> to vector<8x32xf32>
    %91 = arith.mulf %89, %90 : vector<8x32xf32>
    %cst_35 = arith.constant dense<0.000000e+00> : vector<8x32xf32>
    %92 = tpu.matmul %91, %68, %cst_35 {dimension_numbers = #tpu.dot_dimension_numbers<[1], [0], [0], [1], [0, 0, 1, 1], [], []>} : vector<8x32xf32>, vector<32x32xf32>, vector<8x32xf32> -> vector<8x32xf32>
    %93 = arith.mulf %82, %82 : vector<8x32xf32>
    %cst_36 = arith.constant 1.000000e+00 : f32
    %94 = vector.broadcast %cst_36 : f32 to vector<8x32xf32>
    %95 = arith.subf %94, %93 : vector<8x32xf32>
    %96 = arith.mulf %92, %95 : vector<8x32xf32>
    %97 = vector.broadcast %61 : vector<1x32xf32> to vector<8x32xf32>
    %98 = arith.mulf %96, %97 : vector<8x32xf32>
    %cst_37 = arith.constant dense<0.000000e+00> : vector<8xf32>
    %99 = vector.multi_reduction <add>, %98, %cst_37 [1] : vector<8x32xf32> to vector<8xf32>
    %100 = vector.shape_cast %99 : vector<8xf32> to vector<8x1xf32>
    %101 = vector.broadcast %62 : vector<1x32xf32> to vector<8x32xf32>
    %102 = arith.mulf %96, %101 : vector<8x32xf32>
    %cst_38 = arith.constant dense<0.000000e+00> : vector<8xf32>
    %103 = vector.multi_reduction <add>, %102, %cst_38 [1] : vector<8x32xf32> to vector<8xf32>
    %104 = vector.shape_cast %103 : vector<8xf32> to vector<8x1xf32>
    %105 = vector.broadcast %63 : vector<1x32xf32> to vector<8x32xf32>
    %106 = arith.mulf %96, %105 : vector<8x32xf32>
    %cst_39 = arith.constant dense<0.000000e+00> : vector<8xf32>
    %107 = vector.multi_reduction <add>, %106, %cst_39 [1] : vector<8x32xf32> to vector<8xf32>
    %108 = vector.shape_cast %107 : vector<8xf32> to vector<8x1xf32>
    %109 = arith.mulf %41, %4 : vector<8x1xf32>
    %110 = arith.mulf %2, %100 : vector<8x1xf32>
    %111 = arith.mulf %1, %104 : vector<8x1xf32>
    %112 = arith.subf %110, %111 : vector<8x1xf32>
    %113 = arith.addf %112, %109 : vector<8x1xf32>
    %cst_40 = arith.constant 0.000000e+00 : f32
    %114 = vector.broadcast %cst_40 : f32 to vector<8x1xf32>
    %115 = arith.subf %114, %2 : vector<8x1xf32>
    %116 = arith.mulf %115, %108 : vector<8x1xf32>
    %117 = arith.mulf %1, %108 : vector<8x1xf32>
    %118 = arith.mulf %56, %116 : vector<8x1xf32>
    %119 = arith.mulf %60, %117 : vector<8x1xf32>
    %120 = arith.addf %118, %119 : vector<8x1xf32>
    %121 = arith.mulf %34, %113 : vector<8x1xf32>
    %122 = arith.mulf %120, %42 : vector<8x1xf32>
    %123 = arith.addf %121, %122 : vector<8x1xf32>
    %c0_41 = arith.constant 0 : index
    %c0_42 = arith.constant 0 : index
    %124 = vector.load %arg3[%c0_41, %c0_42] : memref<8x4xf32, #tpu.memory_space<vmem>>, vector<8x1xf32>
    tpu.vector_store %arg3[%c0_41, %c0_42], %116 {strides = array<i32>} : memref<8x4xf32, #tpu.memory_space<vmem>>, vector<8x1xf32>,
    %c0_43 = arith.constant 0 : index
    %c1_44 = arith.constant 1 : index
    %125 = vector.load %arg3[%c0_43, %c1_44] : memref<8x4xf32, #tpu.memory_space<vmem>>, vector<8x1xf32>
    tpu.vector_store %arg3[%c0_43, %c1_44], %117 {strides = array<i32>} : memref<8x4xf32, #tpu.memory_space<vmem>>, vector<8x1xf32>,
    %c0_45 = arith.constant 0 : index
    %c2_46 = arith.constant 2 : index
    %126 = vector.load %arg3[%c0_45, %c2_46] : memref<8x4xf32, #tpu.memory_space<vmem>>, vector<8x1xf32>
    tpu.vector_store %arg3[%c0_45, %c2_46], %123 {strides = array<i32>} : memref<8x4xf32, #tpu.memory_space<vmem>>, vector<8x1xf32>,
    %cst_47 = arith.constant 0.000000e+00 : f32
    %127 = vector.broadcast %cst_47 : f32 to vector<8x1xf32>
    %c0_48 = arith.constant 0 : index
    %c3_49 = arith.constant 3 : index
    %128 = vector.load %arg3[%c0_48, %c3_49] : memref<8x4xf32, #tpu.memory_space<vmem>>, vector<8x1xf32>
    tpu.vector_store %arg3[%c0_48, %c3_49], %127 {strides = array<i32>} : memref<8x4xf32, #tpu.memory_space<vmem>>, vector<8x1xf32>,
    return
  }
}

</mosaic_0001>

<bundles_post_ra>
// kernel: symoden_forward.1
= control target key start
LH: loop header
LB: loop body
LE: loop exit
PB: predicated region body
PF: predicated region fallthrough
CT: control target
= control target key end

     0   :  { %v347_v0 = vmov 0   ;;  %v348_v2 = vmov 1   ;;  %vm56_vm0 = vcmask 523264   ;;  %s349_s29 = smov 2   ;;  %v350_v48 = vmov 2   ;;  %s352_s5 = smov 127   ;;  %s552_s0 = inlined_call_operand.vmem [shape: f32[8,4], index: 0, kind: input, shape index: {}]   ;;  %s553_s1 = inlined_call_operand.vmem [shape: f32[136,64], index: 1, kind: input, shape index: {}]   ;;  %s554_s2 = inlined_call_operand.vmem [shape: f32[72,32], index: 2, kind: input, shape index: {}]   ;;  %s555_s3 = inlined_call_operand.vmem [shape: f32[8,4], index: 3, kind: output, shape index: {}]  }
   0x1   :  { %320 = vset.pattern.permute.xlu0 %v347_v0  ;;  %v378_v1 = vld [vmem:[%s552_s0] sm:$0xff]  ;;  %v28_v4 = vld [vmem:[%s553_s1 + $0x38] sm:$0xff]  ;;  %v27_v5 = vld [vmem:[%s553_s1 + $0x30] sm:$0xff]  ;;  %322 = vset.pattern.permute.xlu2 %v350_v48  ;;  %vm181_vm5 = vcmask 261120   ;;  %s353_s6 = smov 1   ;;  %vm288_vm6 = vcmask 7168  }
   0x2   :  { %40 = vperm.xlu0 %320, %v378_v1   ;;  %v29_v3 = vld [vmem:[%s553_s1 + $0x40] sm:$0xff]  ;;  %v26_v6 = vld [vmem:[%s553_s1 + $0x28] sm:$0xff]  ;;  %v24_v8 = vld [vmem:[%s553_s1 + $0x18] sm:$0xff]  ;;  %vm294_vm7 = vcmask 15368   ;;  %vm300_vm8 = vcmask 23568   ;;  %vm302_vm9 = vcmask 31768  }
   0x3   :  { %68 = vmatpush.msra.mxu0 %v29_v3  ;;  %v25_v7 = vld [vmem:[%s553_s1 + $0x20] sm:$0xff]  ;;  %v23_v9 = vld [vmem:[%s553_s1 + $0x10] sm:$0xff]  ;;  %v22_v10 = vld [vmem:[%s553_s1 + $0x8] sm:$0xff] }
   0x4   :  { %v411_v12 = vld [vmem:[%s553_s1] ss:$0 sm:$0xff]  ;;  %v326_v13 = vld [vmem:[%s553_s1 + $0x1] ss:$0 sm:$0xff]  ;;  %v327_v16 = vld [vmem:[%s553_s1 + $0x2] ss:$0 sm:$0xff] }
   0x5   :  { %69 = vmatpush.msra.mxu0 %v28_v4  ;;  %v37_v21 = vld [vmem:[%s553_s1 + $0x80] sm:$0xff]  ;;  %v36_v22 = vld [vmem:[%s553_s1 + $0x78] sm:$0xff]  ;;  %v35_v23 = vld [vmem:[%s553_s1 + $0x70] sm:$0xff] }
   0x6   :  { %127 = vmatpush.msra.mxu1 %v37_v21  ;;  %v34_v24 = vld [vmem:[%s553_s1 + $0x68] sm:$0xff]  ;;  %v33_v25 = vld [vmem:[%s553_s1 + $0x60] sm:$0xff]  ;;  %v32_v26 = vld [vmem:[%s553_s1 + $0x58] sm:$0xff] }
   0x7   :  { %70 = vmatpush.msra.mxu0 %v27_v5  ;;  %v31_v27 = vld [vmem:[%s553_s1 + $0x50] sm:$0xff]  ;;  %v30_v28 = vld [vmem:[%s553_s1 + $0x48] sm:$0xff]  ;;  %v329_v29 = vld [vmem:[%s553_s1 + $0x3] ss:$0 sm:$0xff] }
   0x8   :  { %128 = vmatpush.msra.mxu1 %v36_v22  ;;  %v330_v32 = vld [vmem:[%s553_s1 + $0x4] ss:$0 sm:$0xff]  ;;  %v460_v39 = vld [vmem:[%s553_s1 + $0x6] ss:$0 sm:$0xff]  ;;  %v332_v61 = vld [vmem:[%s553_s1 + $0x5] ss:$0 sm:$0xff] }
   0x9   :  { %71 = vmatpush.msra.mxu0 %v26_v6  ;;  %v159_v3 = vld [vmem:[%s554_s2 + $0x20] sm:$0xff]  ;;  %v158_v4 = vld [vmem:[%s554_s2 + $0x18] sm:$0xff]  ;;  %v157_v5 = vld [vmem:[%s554_s2 + $0x10] sm:$0xff] }
   0xa   :  { %321 = vset.pattern.permute.xlu0 %v348_v2  ;;  %129 = vmatpush.msra.mxu1 %v35_v23  ;;  %v156_v6 = vld [vmem:[%s554_s2 + $0x8] sm:$0xff]  ;;  %v161_v21 = vld [vmem:[%s554_s2 + $0x30] sm:$0xff]  ;;  %v335_v23 = vld [vmem:[%s554_s2 + $0x4] ss:$0 sm:$0xff] }
   0xb   :  { %46 = vperm.xlu0 %321, %v378_v1   ;;  %72 = vmatpush.msra.mxu0 %v25_v7  ;;  %v328_v7 = vld [vmem:[%s554_s2 + $0x1] ss:$0 sm:$0xff]  ;;  %v160_v22 = vld [vmem:[%s554_s2 + $0x28] sm:$0xff] }
   0xc   :  { %130 = vmatpush.msra.mxu1 %v34_v24  ;;  %197 = vmatpush.msra.mxu2 %v159_v3 }
   0xd   :  { %73 = vmatpush.msra.mxu0 %v24_v8  ;;  %v325_v8 = vld [vmem:[%s554_s2] ss:$0 sm:$0xff] }
   0xe   :  { %131 = vmatpush.msra.mxu1 %v33_v25  ;;  %198 = vmatpush.msra.mxu2 %v158_v4 }
   0xf   :  { %74 = vmatpush.msra.mxu0 %v23_v9 }
  0x10   :  { %132 = vmatpush.msra.mxu1 %v32_v26  ;;  %199 = vmatpush.msra.mxu2 %v157_v5 }
  0x11   :  { %75 = vmatpush.msra.mxu0 %v22_v10  ;;  %v333_v10 = vld [vmem:[%s554_s2 + $0x2] ss:$0 sm:$0xff] }
  0x12   :  { %133 = vmatpush.msra.mxu1 %v31_v27  ;;  %200 = vmatpush.msra.mxu2 %v156_v6 }
  0x13   :  { %323 = vset.pattern.permute.xlu0 %v350_v48 }
  0x14   :  { %134 = vmatpush.msra.mxu1 %v30_v28  ;;  %v336_v28 = vld [vmem:[%s554_s2 + $0x5] ss:$0 sm:$0xff] }
  0x74   :  { %v406_v11 = vpop.permute.xlu0 %40 }
  0x75   :  { %v44_v15 = vmul.f32 %v411_v12, %v406_v11 }
  0x7d   :  { %v416_v14 = vpop.permute.xlu0 %46 }
  0x7e   :  { %v50_v17 = vmul.f32 %v326_v13, %v416_v14  ;;  %v167_v9 = vmul.f32 %v328_v7, %v416_v14  ;;  %v163_v14 = vld [vmem:[%s554_s2 + $0x40] sm:$0xff] }
  0x7f   :  { %225 = vmatpush.msra.mxu3 %v163_v14 }
  0x80   :  { %v51_v18 = vadd.f32 %v50_v17, %v44_v15 }
  0x82   :  { %v53_v19 = vadd.f32 %v327_v16, %v51_v18  ;;  %v334_v16 = vld [vmem:[%s554_s2 + $0x3] ss:$0 sm:$0xff] }
  0x84   :  { %337 = vtanh.f32 %v53_v19 }
  0x8a   :  { %v338_v20 = vpop.eup %337 }
  0x8b   :  { %308 = vmatmul.msk.f32.vlgmr.msra.gmra.mxu0 %vm56_vm0, %v338_v20  ;;  %v139_v42 = vmul.f32 %v338_v20, %v338_v20 }
  0x8d   :  { %v140_v44 = vsub.f32 1.0, %v139_v42 }
 0x108   :  { %v77_v30 = vpop.f32.mrf.mxu0 }
 0x109   :  { %v78_v31 = vadd.f32 %v329_v29, %v77_v30 }
 0x10b   :  { %339 = vtanh.f32 %v78_v31 }
 0x111   :  { %v340_v33 = vpop.eup %339 }
 0x112   :  { %v82_v34 = vmul.f32 %v340_v33, %v330_v32  ;;  %v113_v35 = vmul.f32 %v340_v33, %v340_v33  ;;  %v89_v62 = vmul.f32 %v340_v33, %v332_v61 }
 0x114   :  { %v83_v36 = vsel %vm56_vm0, %v82_v34, 0.0  ;;  %v114_v37 = vsub.f32 1.0, %v113_v35  ;;  %v90_v63 = vsel %vm56_vm0, %v89_v62, 0.0 }
 0x115   :  { %84 = vadd.xlane.f32.xlu1 %v83_v36 }
 0x116   :  { %v115_v38 = vmul.f32 %v330_v32, %v114_v37 }
 0x118   :  { %309 = vmatmul.msk.f32.vlgmr.msra.gmra.mxu1 %vm56_vm0, %v115_v38 }
 0x188   :  { %v85_v40 = vpop.xlane.xlu1 %84 }
 0x189   :  { %v463_v41 = vadd.f32 %v460_v39, %v85_v40 }
 0x18b   :  { %95 = vrot.lane.b32.xlu1 %v463_v41, %s349_s29 }
 0x195   :  { %v136_v43 = vpop.f32.mrf.mxu1 }
 0x196   :  { %v141_v45 = vmul.f32 %v140_v44, %v136_v43 }
 0x198   :  { %v146_v46 = vmul.f32 %v326_v13, %v141_v45  ;;  %v142_v0 = vmul.f32 %v411_v12, %v141_v45  ;;  %v165_v12 = vmul.f32 %v325_v8, %v406_v11  ;;  %v162_v11 = vld [vmem:[%s554_s2 + $0x38] sm:$0xff]  ;;  %s351_s2 = smov 126   ;;  %v260_v45 = vsub.f32 0.0, %v378_v1 }
 0x199   :  { %226 = vmatpush.msra.mxu3 %v162_v11 }
 0x19a   :  { %v147_v47 = vsel %vm56_vm0, %v146_v46, 0.0  ;;  %v143_v2 = vsel %vm56_vm0, %v142_v0, 0.0  ;;  %v168_v15 = vadd.f32 %v167_v9, %v165_v12 }
 0x19b   :  { %227 = vmatpush.msra.mxu3 %v161_v21 }
 0x19d   :  { %228 = vmatpush.msra.mxu3 %v160_v22 }
 0x1b5   :  { %148 = vadd.xlane.f32.xlu1 %v147_v47 }
 0x1fd   :  { %v96_v49 = vpop.permute.xlu1 %95 }
 0x1fe   :  { %341 = vrcp.f32 %v96_v49  ;;  %v109_v53 = vand.u32 2147483648, %v96_v49  ;;  %v107_v55 = vand.u32 2147483647, %v96_v49  ;;  %vm103_vm2 = vweird.f32 %v96_v49 }
 0x200   :  { %v110_v57 = vor.u32 1.1754944e-38, %v109_v53  ;;  %vm108_vm4 = vcmp.eq.f32.partialorder %v107_v55, 8.507059e+37 }
 0x204   :  { %v342_v50 = vpop.eup %341 }
 0x205   :  { %v99_v51 = vmul.f32 %v342_v50, %v96_v49  ;;  %vm104_vm1 = vweird.f32 %v342_v50 }
 0x206   :  { %vm105_vm3 = vmor %vm103_vm2, %vm104_vm1 }
 0x207   :  { %v100_v52 = vsub.f32 1.0, %v99_v51 }
 0x209   :  { %v101_v54 = vmul.f32 %v342_v50, %v100_v52 }
 0x20b   :  { %v102_v56 = vadd.f32 %v342_v50, %v101_v54 }
 0x20d   :  { %v106_v58 = vsel %vm105_vm3, %v342_v50, %v102_v56 }
 0x20e   :  { %v111_v59 = vsel %vm108_vm4, %v110_v57, %v106_v58 }
 0x20f   :  { %v469_v60 = vmul.f32 %v111_v59, %v378_v1 }
 0x211   :  { %171 = vperm.xlu2 %322, %v469_v60  }
 0x228   :  { %v149_v51 = vpop.xlane.xlu1 %148 }
 0x23a   :  { %91 = vadd.xlane.f32.xlu2 %v90_v63 }
 0x242   :  { %144 = vadd.xlane.f32.xlu2 %v143_v2 }
 0x26b   :  { %v172_v13 = vpop.permute.xlu2 %171 }
 0x26c   :  { %v175_v17 = vmul.f32 %v333_v10, %v172_v13 }
 0x26e   :  { %v176_v18 = vadd.f32 %v175_v17, %v168_v15 }
 0x270   :  { %v178_v19 = vadd.f32 %v334_v16, %v176_v18 }
 0x272   :  { %343 = vtanh.f32 %v178_v19 }
 0x278   :  { %v344_v20 = vpop.eup %343 }
 0x279   :  { %310 = vmatmul.msk.f32.vlgmr.msra.gmra.mxu2 %vm181_vm5, %v344_v20  ;;  %v233_v31 = vmul.f32 %v344_v20, %v344_v20 }
 0x27b   :  { %v234_v32 = vsub.f32 1.0, %v233_v31 }
 0x2ad   :  { %v92_v43 = vpop.xlane.xlu2 %91 }
 0x2ae   :  { %v93_v56 = vadd.f32 %v460_v39, %v92_v43 }
 0x2b5   :  { %v145_v44 = vpop.xlane.xlu2 %144 }
 0x2fc   :  { %v202_v24 = vpop.f32.mrf.mxu2 }
 0x2fd   :  { %v203_v25 = vadd.f32 %v335_v23, %v202_v24 }
 0x2ff   :  { %345 = vtanh.f32 %v203_v25 }
 0x305   :  { %v346_v26 = vpop.eup %345 }
 0x306   :  { %v206_v27 = vmul.f32 %v346_v26, %v346_v26 }
 0x308   :  { %v207_v29 = vsub.f32 1.0, %v206_v27 }
 0x30a   :  { %v209_v30 = vmul.f32 %v336_v28, %v207_v29 }
 0x30c   :  { %311 = vmatmul.msk.f32.vlgmr.msra.gmra.mxu3 %vm181_vm5, %v209_v30 }
 0x38f   :  { %v230_v33 = vpop.f32.mrf.mxu3 }
 0x390   :  { %v235_v34 = vmul.f32 %v234_v32, %v230_v33 }
 0x392   :  { %v244_v35 = vmul.f32 %v333_v10, %v235_v34  ;;  %v240_v36 = vmul.f32 %v328_v7, %v235_v34  ;;  %v236_v40 = vmul.f32 %v325_v8, %v235_v34  ;;  %v354_v8 = vmov 0.0  }
 0x394   :  { %v245_v37 = vsel %vm181_vm5, %v244_v35, 0.0  ;;  %v241_v38 = vsel %vm181_vm5, %v240_v36, 0.0  ;;  %v237_v42 = vsel %vm181_vm5, %v236_v40, 0.0 }
 0x395   :  { %246 = vadd.xlane.f32.xlu0 %v245_v37  ;;  %242 = vadd.xlane.f32.xlu2 %v241_v38 }
 0x39d   :  { %238 = vadd.xlane.f32.xlu2 %v237_v42 }
 0x3a9   :  { %248 = vrot.lane.b32.xlu0 %v378_v1, %s351_s2 }
 0x3b1   :  { %275 = vrot.lane.b32.xlu0 %v469_v60, %s352_s5 }
 0x408   :  { %v247_v46 = vpop.xlane.xlu0 %246  ;;  %v243_v47 = vpop.xlane.xlu2 %242 }
 0x409   :  { %v261_v48 = vmul.f32 %v260_v45, %v247_v46  ;;  %v262_v49 = vmul.f32 %v247_v46, %v378_v1  ;;  %v253_v50 = vmul.f32 %v243_v47, %v378_v1 }
 0x40b   :  { %v264_v52 = vmul.f32 %v262_v49, %v149_v51  ;;  %255 = vrot.lane.b32.xlu2 %v253_v50, %s353_s6  ;;  %v263_v53 = vmul.f32 %v261_v48, %v145_v44 }
 0x40d   :  { %266 = vrot.lane.b32.xlu1 %v264_v52, %s353_s6 }
 0x410   :  { %v239_v54 = vpop.xlane.xlu2 %238 }
 0x411   :  { %v252_v57 = vmul.f32 %v239_v54, %v378_v1 }
 0x415   :  { %285 = vrot.lane.b32.xlu1 %v261_v48, %s352_s5 }
 0x41b   :  { %v249_v55 = vpop.permute.xlu0 %248 }
 0x41c   :  { %v251_v59 = vmul.f32 %v249_v55, %v93_v56 }
 0x423   :  { %v276_v0 = vpop.permute.xlu0 %275 }
 0x465   :  { %v256_v58 = vpop.permute.xlu2 %255 }
 0x466   :  { %v258_v60 = vsub.f32 %v252_v57, %v256_v58 }
 0x468   :  { %v259_v61 = vadd.f32 %v258_v60, %v251_v59 }
 0x46a   :  { %271 = vrot.lane.b32.xlu0 %v259_v61, %s352_s5 }
 0x472   :  { %291 = vrot.lane.b32.xlu0 %v262_v49, %s353_s6 }
 0x47f   :  { %v267_v62 = vpop.permute.xlu1 %266 }
 0x480   :  { %v269_v63 = vadd.f32 %v267_v62, %v263_v53 }
 0x482   :  { %v278_v2 = vmul.f32 %v276_v0, %v269_v63 }
 0x484   :  { %280 = vrot.lane.b32.xlu2 %v278_v2, %s352_s5 }
 0x487   :  { %v286_v3 = vpop.permute.xlu1 %285 }
 0x488   :  { %289 = vst.msk [vmem:[%s555_s3] sm:$0xff] %vm288_vm6, %v286_v3 }
 0x4dc   :  { %v272_v1 = vpop.permute.xlu0 %271 }
 0x4dd   :  { %v274_v39 = vmul.f32 %v272_v1, %v463_v41 }
 0x4de   :  { %v281_v4 = vpop.permute.xlu2 %280 }
 0x4df   :  { %v283_v5 = vadd.f32 %v281_v4, %v274_v39 }
 0x4e1   :  { %297 = vrot.lane.b32.xlu2 %v283_v5, %s349_s29 }
 0x4e4   :  { %v292_v6 = vpop.permute.xlu0 %291 }
 0x4e5   :  { %295 = vst.msk [vmem:[%s555_s3] sm:$0xff] %vm294_vm7, %v292_v6 }
 0x53b   :  { %v298_v7 = vpop.permute.xlu2 %297 }
 0x53c   :  { %301 = vst.msk [vmem:[%s555_s3] sm:$0xff] %vm300_vm8, %v298_v7 }
 0x53d   :  { %303 = vst.msk [vmem:[%s555_s3] sm:$0xff] %vm302_vm9, %v354_v8 }

</bundles_post_ra>
